<compile_context>
chip_gen: v5e
topology: v5e:2x2
jax: 0.10.0
libtpu: 0.0.40
codegen_flags: <defaults>
</compile_context>

<pallas_src>
import math
import functools

import jax
import jax.numpy as jnp
from jax.experimental import pallas as pl
from jax.experimental.pallas import tpu as pltpu


# --------------------------------------------------------------------------
# Pallas kernel: one full BERT encoder block for one batch element.
# --------------------------------------------------------------------------
def _encoder_block_kernel(
    vl_ref,                                  # scalar-prefetch: (B,) int32 SMEM
    x_ref,                                   # (1, S, H) f32  residual stream
    wq_ref, wk_ref, wv_ref,                  # (nh, H, dh) bf16 (wq pre-scaled)
    wo_ref,                                  # (nh, dh, H) bf16
    g1_ref, be1_ref,                         # (1, H) f32  LayerNorm-1
    w1_ref, bf1_ref,                         # (H, F) bf16, (1, F) f32  dense1
    w2_ref, bf2_ref,                         # (F, H) bf16, (1, H) f32  dense2
    g2_ref, be2_ref,                         # (1, H) f32  LayerNorm-2
    o_ref,                                   # (1, S, H) f32
    *, num_heads: int,
):
    b = pl.program_id(0)
    x = x_ref[0]                             # (S, H) f32
    S, H = x.shape
    xb = x.astype(jnp.bfloat16)              # bf16 operand for MXU matmuls

    # ---- attention mask from valid_lens (key index < valid_len) -----------
    vl = vl_ref[b]                                              # scalar int32
    key_ids = jax.lax.broadcasted_iota(jnp.int32, (S, S), 1)
    valid = key_ids < vl                                        # (S, S) bool

    # ---- multi-head self attention, per-head weight slabs ------------------
    # attn = sum_h softmax(mask(q_h k_h^T)) v_h @ Wo_h   (no concat needed)
    attn = jnp.zeros((S, H), jnp.float32)
    for h in range(num_heads):                                  # static unroll
        qh = jnp.dot(xb, wq_ref[h], preferred_element_type=jnp.float32)
        kh = jnp.dot(xb, wk_ref[h], preferred_element_type=jnp.float32)
        vh = jnp.dot(xb, wv_ref[h], preferred_element_type=jnp.float32)
        # scores = q_h @ k_h^T  (contract last dims; 1/sqrt(dh) folded in Wq)
        scores = jax.lax.dot_general(
            qh.astype(jnp.bfloat16), kh.astype(jnp.bfloat16),
            (((1,), (1,)), ((), ())),
            preferred_element_type=jnp.float32)                 # (S, S) f32
        scores = jnp.where(valid, scores, -1e6)                 # masked softmax
        m = jnp.max(scores, axis=-1, keepdims=True)
        e = jnp.exp(scores - m)
        p = e * pl.reciprocal(jnp.sum(e, axis=-1, keepdims=True), approx=True)
        ctx = jnp.dot(p.astype(jnp.bfloat16), vh.astype(jnp.bfloat16),
                      preferred_element_type=jnp.float32)       # (S, dh) f32
        attn = attn + jnp.dot(ctx.astype(jnp.bfloat16), wo_ref[h],
                              preferred_element_type=jnp.float32)

    # ---- AddNorm 1 (dropout = identity in eval; stats in f32) --------------
    y = x + attn
    mu = jnp.mean(y, axis=-1, keepdims=True)
    var = jnp.mean((y - mu) ** 2, axis=-1, keepdims=True)
    y = (y - mu) * jax.lax.rsqrt(var + 1e-5) * g1_ref[...] + be1_ref[...]

    # ---- position-wise FFN: dense1 -> ReLU -> dense2 (bf16 MXU, f32 acc) ---
    f = jnp.dot(y.astype(jnp.bfloat16), w1_ref[...],
                preferred_element_type=jnp.float32) + bf1_ref[...]
    f = jnp.maximum(f, 0.0)
    f = jnp.dot(f.astype(jnp.bfloat16), w2_ref[...],
                preferred_element_type=jnp.float32) + bf2_ref[...]

    # ---- AddNorm 2 ----------------------------------------------------------
    z = y + f
    mu2 = jnp.mean(z, axis=-1, keepdims=True)
    var2 = jnp.mean((z - mu2) ** 2, axis=-1, keepdims=True)
    z = (z - mu2) * jax.lax.rsqrt(var2 + 1e-5) * g2_ref[...] + be2_ref[...]

    o_ref[0] = z


# --------------------------------------------------------------------------
# Wrapper: one encoder block over the full batch via pallas_call.
# --------------------------------------------------------------------------
def encoder_block(x, valid_lens, kb, num_heads):
    B, S, H = x.shape
    nh = num_heads
    dh = H // nh
    F = kb["w1"].shape[1]

    def const(shape):
        # grid-invariant (weight / bias / LN) tiles: block index always 0
        return pl.BlockSpec(shape, lambda b, vl, _s=shape: (0,) * len(_s))

    grid_spec = pltpu.PrefetchScalarGridSpec(
        num_scalar_prefetch=1,            # valid_lens -> SMEM
        grid=(B,),
        in_specs=[
            pl.BlockSpec((1, S, H), lambda b, vl: (b, 0, 0)),   # x
            const((nh, H, dh)), const((nh, H, dh)), const((nh, H, dh)),  # Wq,Wk,Wv
            const((nh, dh, H)),                                  # Wo (per head)
            const((1, H)), const((1, H)),                        # LN1 gamma/beta
            const((H, F)), const((1, F)),                        # dense1 W,b
            const((F, H)), const((1, H)),                        # dense2 W,b
            const((1, H)), const((1, H)),                        # LN2 gamma/beta
        ],
        out_specs=pl.BlockSpec((1, S, H), lambda b, vl: (b, 0, 0)),
    )

    return pl.pallas_call(
        functools.partial(_encoder_block_kernel, num_heads=num_heads),
        grid_spec=grid_spec,
        out_shape=jax.ShapeDtypeStruct((B, S, H), jnp.float32),
        compiler_params=pltpu.CompilerParams(
            dimension_semantics=("parallel",),
            vmem_limit_bytes=48 * 1024 * 1024),
    )(
        valid_lens, x,
        kb["wq"], kb["wk"], kb["wv"], kb["wo"],
        kb["ln1_g"], kb["ln1_b"],
        kb["w1"], kb["b1"],
        kb["w2"], kb["b2"],
        kb["ln2_g"], kb["ln2_b"],
    )


# --------------------------------------------------------------------------
# Full BertEncoder forward (embedding gathers + pos-enc add are plain-JAX glue).
# --------------------------------------------------------------------------
def bert_encoder(tokens, segments, valid_lens, kparams, num_heads):
    S = tokens.shape[1]
    x = kparams["tok_emb"][tokens] + kparams["seg_emb"][segments]
    x = x + kparams["pos_enc"][:, :S, :]
    for kb in kparams["blocks"]:
        x = encoder_block(x, valid_lens, kb, num_heads)
    return x


# --------------------------------------------------------------------------
# Host-side parameter preparation (one-time layout plumbing):
#   - pre-transpose nn.Linear weights (x @ W instead of x @ W.T in-kernel)
#   - split Q/K/V/O weights per attention head
#   - fold the 1/sqrt(dh) scale into Wq
#   - cast matmul weights to bf16 (LN params / biases stay f32)
# --------------------------------------------------------------------------
def prepare_block_params(blk, num_heads):
    H = blk["wq"].shape[0]
    dh = H // num_heads
    scale = 1.0 / math.sqrt(dh)

    def split_heads_in_to_out(w, s=1.0):
        # torch layout (out=H, in=H); q = x @ w.T  ->  pre-transpose to (in, out)
        wt = (s * w).T                                   # (H_in, H_out)
        return (wt.reshape(H, num_heads, dh)
                  .transpose(1, 0, 2)                    # (nh, H, dh)
                  .astype(jnp.bfloat16))

    wo_t = blk["wo"].T                                   # (H_in, H_out)
    return {
        "wq": split_heads_in_to_out(blk["wq"], scale),
        "wk": split_heads_in_to_out(blk["wk"]),
        "wv": split_heads_in_to_out(blk["wv"]),
        "wo": wo_t.reshape(num_heads, dh, H).astype(jnp.bfloat16),  # (nh, dh, H)
        "ln1_g": blk["ln1_g"], "ln1_b": blk["ln1_b"],
        "w1": blk["w1"].T.astype(jnp.bfloat16),          # (H, F)
        "b1": blk["b1"],                                  # (1, F) f32
        "w2": blk["w2"].T.astype(jnp.bfloat16),          # (F, H)
        "b2": blk["b2"],                                  # (1, H) f32
        "ln2_g": blk["ln2_g"], "ln2_b": blk["ln2_b"],
    }


def prepare_params(params, num_heads):
    return {
        "tok_emb": params["tok_emb"],
        "seg_emb": params["seg_emb"],
        "pos_enc": params["pos_enc"],
        "blocks": [prepare_block_params(b, num_heads) for b in params["blocks"]],
    }


# --------------------------------------------------------------------------
# Deterministic parameter construction (synthetic init, torch conventions).
# --------------------------------------------------------------------------
def init_params(key, vocab_size, num_hiddens, num_heads, ffn_num_hiddens,
                num_layers, max_len):
    H, F = num_hiddens, ffn_num_hiddens
    keys = jax.random.split(key, 3 + num_layers)
    params = {
        "tok_emb": 0.1 * jax.random.normal(keys[0], (vocab_size, H), jnp.float32),
        "seg_emb": 0.1 * jax.random.normal(keys[1], (2, H), jnp.float32),
        "pos_enc": 0.1 * jax.random.normal(keys[2], (1, max_len, H), jnp.float32),
        "blocks": [],
    }
    for i in range(num_layers):
        ks = jax.random.split(keys[3 + i], 10)
        blk = {
            "wq": 0.1 * jax.random.normal(ks[0], (H, H), jnp.float32),
            "wk": 0.1 * jax.random.normal(ks[1], (H, H), jnp.float32),
            "wv": 0.1 * jax.random.normal(ks[2], (H, H), jnp.float32),
            "wo": 0.1 * jax.random.normal(ks[3], (H, H), jnp.float32),
            "ln1_g": jnp.ones((1, H), jnp.float32),
            "ln1_b": jnp.zeros((1, H), jnp.float32),
            "w1": 0.1 * jax.random.normal(ks[4], (F, H), jnp.float32),
            "b1": 0.01 * jax.random.normal(ks[5], (1, F), jnp.float32),
            "w2": 0.1 * jax.random.normal(ks[6], (H, F), jnp.float32),
            "b2": 0.01 * jax.random.normal(ks[7], (1, H), jnp.float32),
            "ln2_g": jnp.ones((1, H), jnp.float32),
            "ln2_b": jnp.zeros((1, H), jnp.float32),
        }
        params["blocks"].append(blk)
    return params


if __name__ == "__main__":
    # small shapes consistent with the module's forward
    vocab_size = 50
    num_hiddens = 32
    num_heads = 2
    ffn_num_hiddens = 64
    num_layers = 2
    max_len = 16
    B, S = 2, 8

    key = jax.random.PRNGKey(0)
    kp, kt, ks = jax.random.split(key, 3)

    params = init_params(kp, vocab_size, num_hiddens, num_heads,
                         ffn_num_hiddens, num_layers, max_len)
    kparams = prepare_params(params, num_heads)     # host-side layout plumbing

    tokens = jax.random.randint(kt, (B, S), 0, vocab_size, dtype=jnp.int32)
    segments = jax.random.randint(ks, (B, S), 0, 2, dtype=jnp.int32)
    valid_lens = jnp.array([8, 5], dtype=jnp.int32)

    out = bert_encoder(tokens, segments, valid_lens, kparams, num_heads)
    out = jax.block_until_ready(out)
    assert out.shape == (B, S, num_hiddens)
    print("KERNEL_OK")
</pallas_src>

<mosaic_0001>
module attributes {stable_mosaic.version = 11 : i64} {
  func.func @_encoder_block_kernel(%arg0: i32, %arg1: memref<2xi32, #tpu.memory_space<smem>>, %arg2: memref<1x8x32xf32, #tpu.memory_space<vmem>>, %arg3: memref<2x32x16xbf16, #tpu.memory_space<vmem>>, %arg4: memref<2x32x16xbf16, #tpu.memory_space<vmem>>, %arg5: memref<2x32x16xbf16, #tpu.memory_space<vmem>>, %arg6: memref<2x16x32xbf16, #tpu.memory_space<vmem>>, %arg7: memref<1x32xf32, #tpu.memory_space<vmem>>, %arg8: memref<1x32xf32, #tpu.memory_space<vmem>>, %arg9: memref<32x64xbf16, #tpu.memory_space<vmem>>, %arg10: memref<1x64xf32, #tpu.memory_space<vmem>>, %arg11: memref<64x32xbf16, #tpu.memory_space<vmem>>, %arg12: memref<1x32xf32, #tpu.memory_space<vmem>>, %arg13: memref<1x32xf32, #tpu.memory_space<vmem>>, %arg14: memref<1x32xf32, #tpu.memory_space<vmem>>, %arg15: memref<1x8x32xf32, #tpu.memory_space<vmem>>) attributes {dimension_semantics = [#tpu.dimension_semantics<parallel>], iteration_bounds = array<i64: 2>, scalar_prefetch = 1 : i64, scratch_operands = 0 : i64, tpu.core_type = #tpu.core_type<tc>, window_params = [{transform_indices = @transform_0, window_bounds = array<i64: 1, 8, 32>}, {pipeline_mode = #tpu.pipeline_mode<synchronous>, transform_indices = @transform_1, window_bounds = array<i64: 2, 32, 16>}, {pipeline_mode = #tpu.pipeline_mode<synchronous>, transform_indices = @transform_2, window_bounds = array<i64: 2, 32, 16>}, {pipeline_mode = #tpu.pipeline_mode<synchronous>, transform_indices = @transform_3, window_bounds = array<i64: 2, 32, 16>}, {pipeline_mode = #tpu.pipeline_mode<synchronous>, transform_indices = @transform_4, window_bounds = array<i64: 2, 16, 32>}, {pipeline_mode = #tpu.pipeline_mode<synchronous>, transform_indices = @transform_5, window_bounds = array<i64: 1, 32>}, {pipeline_mode = #tpu.pipeline_mode<synchronous>, transform_indices = @transform_6, window_bounds = array<i64: 1, 32>}, {pipeline_mode = #tpu.pipeline_mode<synchronous>, transform_indices = @transform_7, window_bounds = array<i64: 32, 64>}, {pipeline_mode = #tpu.pipeline_mode<synchronous>, transform_indices = @transform_8, window_bounds = array<i64: 1, 64>}, {pipeline_mode = #tpu.pipeline_mode<synchronous>, transform_indices = @transform_9, window_bounds = array<i64: 64, 32>}, {pipeline_mode = #tpu.pipeline_mode<synchronous>, transform_indices = @transform_10, window_bounds = array<i64: 1, 32>}, {pipeline_mode = #tpu.pipeline_mode<synchronous>, transform_indices = @transform_11, window_bounds = array<i64: 1, 32>}, {pipeline_mode = #tpu.pipeline_mode<synchronous>, transform_indices = @transform_12, window_bounds = array<i64: 1, 32>}, {transform_indices = @transform_13, window_bounds = array<i64: 1, 8, 32>}]} {
    %c0 = arith.constant 0 : index
    %c0_0 = arith.constant 0 : index
    %c0_1 = arith.constant 0 : index
    %0 = vector.load %arg2[%c0, %c0_0, %c0_1] : memref<1x8x32xf32, #tpu.memory_space<vmem>>, vector<1x8x32xf32>
    %1 = vector.shape_cast %0 : vector<1x8x32xf32> to vector<8x32xf32>
    %2 = arith.truncf %1 : vector<8x32xf32> to vector<8x32xbf16>
    %3 = arith.index_cast %arg0 : i32 to index
    %4 = memref.load %arg1[%3] : memref<2xi32, #tpu.memory_space<smem>>
    %5 = tpu.iota {dimensions = array<i32: 1>} : vector<8x8xi32>
    %6 = vector.broadcast %4 : i32 to vector<8x8xi32>
    %7 = arith.cmpi slt, %5, %6 : vector<8x8xi32>
    %cst = arith.constant 0.000000e+00 : f32
    %8 = vector.broadcast %cst : f32 to vector<8x32xf32>
    %c0_2 = arith.constant 0 : index
    %c0_3 = arith.constant 0 : index
    %c0_4 = arith.constant 0 : index
    %9 = vector.load %arg3[%c0_2, %c0_3, %c0_4] : memref<2x32x16xbf16, #tpu.memory_space<vmem>>, vector<1x32x16xbf16>
    %10 = vector.shape_cast %9 : vector<1x32x16xbf16> to vector<32x16xbf16>
    %cst_5 = arith.constant dense<0.000000e+00> : vector<8x16xf32>
    %11 = tpu.matmul %2, %10, %cst_5 {dimension_numbers = #tpu.dot_dimension_numbers<[1], [0], [0], [1], [0, 0, 1, 1], [], []>} : vector<8x32xbf16>, vector<32x16xbf16>, vector<8x16xf32> -> vector<8x16xf32>
    %c0_6 = arith.constant 0 : index
    %c0_7 = arith.constant 0 : index
    %c0_8 = arith.constant 0 : index
    %12 = vector.load %arg4[%c0_6, %c0_7, %c0_8] : memref<2x32x16xbf16, #tpu.memory_space<vmem>>, vector<1x32x16xbf16>
    %13 = vector.shape_cast %12 : vector<1x32x16xbf16> to vector<32x16xbf16>
    %cst_9 = arith.constant dense<0.000000e+00> : vector<8x16xf32>
    %14 = tpu.matmul %2, %13, %cst_9 {dimension_numbers = #tpu.dot_dimension_numbers<[1], [0], [0], [1], [0, 0, 1, 1], [], []>} : vector<8x32xbf16>, vector<32x16xbf16>, vector<8x16xf32> -> vector<8x16xf32>
    %c0_10 = arith.constant 0 : index
    %c0_11 = arith.constant 0 : index
    %c0_12 = arith.constant 0 : index
    %15 = vector.load %arg5[%c0_10, %c0_11, %c0_12] : memref<2x32x16xbf16, #tpu.memory_space<vmem>>, vector<1x32x16xbf16>
    %16 = vector.shape_cast %15 : vector<1x32x16xbf16> to vector<32x16xbf16>
    %cst_13 = arith.constant dense<0.000000e+00> : vector<8x16xf32>
    %17 = tpu.matmul %2, %16, %cst_13 {dimension_numbers = #tpu.dot_dimension_numbers<[1], [0], [0], [1], [0, 0, 1, 1], [], []>} : vector<8x32xbf16>, vector<32x16xbf16>, vector<8x16xf32> -> vector<8x16xf32>
    %18 = arith.truncf %11 : vector<8x16xf32> to vector<8x16xbf16>
    %19 = arith.truncf %14 : vector<8x16xf32> to vector<8x16xbf16>
    %cst_14 = arith.constant dense<0.000000e+00> : vector<8x8xf32>
    %20 = tpu.matmul %18, %19, %cst_14 {dimension_numbers = #tpu.dot_dimension_numbers<[1], [1], [0], [0], [0, 0, 1, 0], [], []>} : vector<8x16xbf16>, vector<8x16xbf16>, vector<8x8xf32> -> vector<8x8xf32>
    %cst_15 = arith.constant -1.000000e+06 : f32
    %21 = vector.broadcast %cst_15 : f32 to vector<8x8xf32>
    %22 = arith.select %7, %20, %21 : vector<8x8xi1>, vector<8x8xf32>
    %cst_16 = arith.constant dense<0xFF800000> : vector<8xf32>
    %23 = vector.multi_reduction <maximumf>, %22, %cst_16 [1] : vector<8x8xf32> to vector<8xf32>
    %24 = vector.shape_cast %23 : vector<8xf32> to vector<8x1xf32>
    %25 = vector.broadcast %24 : vector<8x1xf32> to vector<8x8xf32>
    %26 = arith.subf %22, %25 : vector<8x8xf32>
    %27 = math.exp %26 : vector<8x8xf32>
    %cst_17 = arith.constant dense<0.000000e+00> : vector<8xf32>
    %28 = vector.multi_reduction <add>, %27, %cst_17 [1] : vector<8x8xf32> to vector<8xf32>
    %29 = vector.shape_cast %28 : vector<8xf32> to vector<8x1xf32>
    %30 = tpu.reciprocal %29 {approx = true} : vector<8x1xf32> -> vector<8x1xf32>
    %31 = vector.broadcast %30 : vector<8x1xf32> to vector<8x8xf32>
    %32 = arith.mulf %27, %31 : vector<8x8xf32>
    %33 = arith.truncf %32 : vector<8x8xf32> to vector<8x8xbf16>
    %34 = arith.truncf %17 : vector<8x16xf32> to vector<8x16xbf16>
    %cst_18 = arith.constant dense<0.000000e+00> : vector<8x16xf32>
    %35 = tpu.matmul %33, %34, %cst_18 {dimension_numbers = #tpu.dot_dimension_numbers<[1], [0], [0], [1], [0, 0, 1, 1], [], []>} : vector<8x8xbf16>, vector<8x16xbf16>, vector<8x16xf32> -> vector<8x16xf32>
    %36 = arith.truncf %35 : vector<8x16xf32> to vector<8x16xbf16>
    %c0_19 = arith.constant 0 : index
    %c0_20 = arith.constant 0 : index
    %c0_21 = arith.constant 0 : index
    %37 = vector.load %arg6[%c0_19, %c0_20, %c0_21] : memref<2x16x32xbf16, #tpu.memory_space<vmem>>, vector<1x16x32xbf16>
    %38 = vector.shape_cast %37 : vector<1x16x32xbf16> to vector<16x32xbf16>
    %cst_22 = arith.constant dense<0.000000e+00> : vector<8x32xf32>
    %39 = tpu.matmul %36, %38, %cst_22 {dimension_numbers = #tpu.dot_dimension_numbers<[1], [0], [0], [1], [0, 0, 1, 1], [], []>} : vector<8x16xbf16>, vector<16x32xbf16>, vector<8x32xf32> -> vector<8x32xf32>
    %40 = arith.addf %8, %39 : vector<8x32xf32>
    %c1 = arith.constant 1 : index
    %c0_23 = arith.constant 0 : index
    %c0_24 = arith.constant 0 : index
    %41 = vector.load %arg3[%c1, %c0_23, %c0_24] : memref<2x32x16xbf16, #tpu.memory_space<vmem>>, vector<1x32x16xbf16>
    %42 = vector.shape_cast %41 : vector<1x32x16xbf16> to vector<32x16xbf16>
    %cst_25 = arith.constant dense<0.000000e+00> : vector<8x16xf32>
    %43 = tpu.matmul %2, %42, %cst_25 {dimension_numbers = #tpu.dot_dimension_numbers<[1], [0], [0], [1], [0, 0, 1, 1], [], []>} : vector<8x32xbf16>, vector<32x16xbf16>, vector<8x16xf32> -> vector<8x16xf32>
    %c1_26 = arith.constant 1 : index
    %c0_27 = arith.constant 0 : index
    %c0_28 = arith.constant 0 : index
    %44 = vector.load %arg4[%c1_26, %c0_27, %c0_28] : memref<2x32x16xbf16, #tpu.memory_space<vmem>>, vector<1x32x16xbf16>
    %45 = vector.shape_cast %44 : vector<1x32x16xbf16> to vector<32x16xbf16>
    %cst_29 = arith.constant dense<0.000000e+00> : vector<8x16xf32>
    %46 = tpu.matmul %2, %45, %cst_29 {dimension_numbers = #tpu.dot_dimension_numbers<[1], [0], [0], [1], [0, 0, 1, 1], [], []>} : vector<8x32xbf16>, vector<32x16xbf16>, vector<8x16xf32> -> vector<8x16xf32>
    %c1_30 = arith.constant 1 : index
    %c0_31 = arith.constant 0 : index
    %c0_32 = arith.constant 0 : index
    %47 = vector.load %arg5[%c1_30, %c0_31, %c0_32] : memref<2x32x16xbf16, #tpu.memory_space<vmem>>, vector<1x32x16xbf16>
    %48 = vector.shape_cast %47 : vector<1x32x16xbf16> to vector<32x16xbf16>
    %cst_33 = arith.constant dense<0.000000e+00> : vector<8x16xf32>
    %49 = tpu.matmul %2, %48, %cst_33 {dimension_numbers = #tpu.dot_dimension_numbers<[1], [0], [0], [1], [0, 0, 1, 1], [], []>} : vector<8x32xbf16>, vector<32x16xbf16>, vector<8x16xf32> -> vector<8x16xf32>
    %50 = arith.truncf %43 : vector<8x16xf32> to vector<8x16xbf16>
    %51 = arith.truncf %46 : vector<8x16xf32> to vector<8x16xbf16>
    %cst_34 = arith.constant dense<0.000000e+00> : vector<8x8xf32>
    %52 = tpu.matmul %50, %51, %cst_34 {dimension_numbers = #tpu.dot_dimension_numbers<[1], [1], [0], [0], [0, 0, 1, 0], [], []>} : vector<8x16xbf16>, vector<8x16xbf16>, vector<8x8xf32> -> vector<8x8xf32>
    %cst_35 = arith.constant -1.000000e+06 : f32
    %53 = vector.broadcast %cst_35 : f32 to vector<8x8xf32>
    %54 = arith.select %7, %52, %53 : vector<8x8xi1>, vector<8x8xf32>
    %cst_36 = arith.constant dense<0xFF800000> : vector<8xf32>
    %55 = vector.multi_reduction <maximumf>, %54, %cst_36 [1] : vector<8x8xf32> to vector<8xf32>
    %56 = vector.shape_cast %55 : vector<8xf32> to vector<8x1xf32>
    %57 = vector.broadcast %56 : vector<8x1xf32> to vector<8x8xf32>
    %58 = arith.subf %54, %57 : vector<8x8xf32>
    %59 = math.exp %58 : vector<8x8xf32>
    %cst_37 = arith.constant dense<0.000000e+00> : vector<8xf32>
    %60 = vector.multi_reduction <add>, %59, %cst_37 [1] : vector<8x8xf32> to vector<8xf32>
    %61 = vector.shape_cast %60 : vector<8xf32> to vector<8x1xf32>
    %62 = tpu.reciprocal %61 {approx = true} : vector<8x1xf32> -> vector<8x1xf32>
    %63 = vector.broadcast %62 : vector<8x1xf32> to vector<8x8xf32>
    %64 = arith.mulf %59, %63 : vector<8x8xf32>
    %65 = arith.truncf %64 : vector<8x8xf32> to vector<8x8xbf16>
    %66 = arith.truncf %49 : vector<8x16xf32> to vector<8x16xbf16>
    %cst_38 = arith.constant dense<0.000000e+00> : vector<8x16xf32>
    %67 = tpu.matmul %65, %66, %cst_38 {dimension_numbers = #tpu.dot_dimension_numbers<[1], [0], [0], [1], [0, 0, 1, 1], [], []>} : vector<8x8xbf16>, vector<8x16xbf16>, vector<8x16xf32> -> vector<8x16xf32>
    %68 = arith.truncf %67 : vector<8x16xf32> to vector<8x16xbf16>
    %c1_39 = arith.constant 1 : index
    %c0_40 = arith.constant 0 : index
    %c0_41 = arith.constant 0 : index
    %69 = vector.load %arg6[%c1_39, %c0_40, %c0_41] : memref<2x16x32xbf16, #tpu.memory_space<vmem>>, vector<1x16x32xbf16>
    %70 = vector.shape_cast %69 : vector<1x16x32xbf16> to vector<16x32xbf16>
    %cst_42 = arith.constant dense<0.000000e+00> : vector<8x32xf32>
    %71 = tpu.matmul %68, %70, %cst_42 {dimension_numbers = #tpu.dot_dimension_numbers<[1], [0], [0], [1], [0, 0, 1, 1], [], []>} : vector<8x16xbf16>, vector<16x32xbf16>, vector<8x32xf32> -> vector<8x32xf32>
    %72 = arith.addf %40, %71 : vector<8x32xf32>
    %73 = arith.addf %1, %72 : vector<8x32xf32>
    %cst_43 = arith.constant dense<0.000000e+00> : vector<8xf32>
    %74 = vector.multi_reduction <add>, %73, %cst_43 [1] : vector<8x32xf32> to vector<8xf32>
    %75 = vector.shape_cast %74 : vector<8xf32> to vector<8x1xf32>
    %cst_44 = arith.constant 3.200000e+01 : f32
    %76 = vector.broadcast %cst_44 : f32 to vector<8x1xf32>
    %77 = arith.divf %75, %76 : vector<8x1xf32>
    %78 = vector.broadcast %77 : vector<8x1xf32> to vector<8x32xf32>
    %79 = arith.subf %73, %78 : vector<8x32xf32>
    %80 = arith.mulf %79, %79 : vector<8x32xf32>
    %cst_45 = arith.constant dense<0.000000e+00> : vector<8xf32>
    %81 = vector.multi_reduction <add>, %80, %cst_45 [1] : vector<8x32xf32> to vector<8xf32>
    %82 = vector.shape_cast %81 : vector<8xf32> to vector<8x1xf32>
    %cst_46 = arith.constant 3.200000e+01 : f32
    %83 = vector.broadcast %cst_46 : f32 to vector<8x1xf32>
    %84 = arith.divf %82, %83 : vector<8x1xf32>
    %85 = vector.broadcast %77 : vector<8x1xf32> to vector<8x32xf32>
    %86 = arith.subf %73, %85 : vector<8x32xf32>
    %cst_47 = arith.constant 9.99999974E-6 : f32
    %87 = vector.broadcast %cst_47 : f32 to vector<8x1xf32>
    %88 = arith.addf %84, %87 : vector<8x1xf32>
    %89 = math.rsqrt %88 : vector<8x1xf32>
    %90 = vector.broadcast %89 : vector<8x1xf32> to vector<8x32xf32>
    %91 = arith.mulf %86, %90 : vector<8x32xf32>
    %c0_48 = arith.constant 0 : index
    %c0_49 = arith.constant 0 : index
    %92 = vector.load %arg7[%c0_48, %c0_49] : memref<1x32xf32, #tpu.memory_space<vmem>>, vector<1x32xf32>
    %93 = vector.broadcast %92 : vector<1x32xf32> to vector<8x32xf32>
    %94 = arith.mulf %91, %93 : vector<8x32xf32>
    %c0_50 = arith.constant 0 : index
    %c0_51 = arith.constant 0 : index
    %95 = vector.load %arg8[%c0_50, %c0_51] : memref<1x32xf32, #tpu.memory_space<vmem>>, vector<1x32xf32>
    %96 = vector.broadcast %95 : vector<1x32xf32> to vector<8x32xf32>
    %97 = arith.addf %94, %96 : vector<8x32xf32>
    %98 = arith.truncf %97 : vector<8x32xf32> to vector<8x32xbf16>
    %c0_52 = arith.constant 0 : index
    %c0_53 = arith.constant 0 : index
    %99 = vector.load %arg9[%c0_52, %c0_53] : memref<32x64xbf16, #tpu.memory_space<vmem>>, vector<32x64xbf16>
    %cst_54 = arith.constant dense<0.000000e+00> : vector<8x64xf32>
    %100 = tpu.matmul %98, %99, %cst_54 {dimension_numbers = #tpu.dot_dimension_numbers<[1], [0], [0], [1], [0, 0, 1, 1], [], []>} : vector<8x32xbf16>, vector<32x64xbf16>, vector<8x64xf32> -> vector<8x64xf32>
    %c0_55 = arith.constant 0 : index
    %c0_56 = arith.constant 0 : index
    %101 = vector.load %arg10[%c0_55, %c0_56] : memref<1x64xf32, #tpu.memory_space<vmem>>, vector<1x64xf32>
    %102 = vector.broadcast %101 : vector<1x64xf32> to vector<8x64xf32>
    %103 = arith.addf %100, %102 : vector<8x64xf32>
    %cst_57 = arith.constant 0.000000e+00 : f32
    %104 = vector.broadcast %cst_57 : f32 to vector<8x64xf32>
    %105 = arith.maximumf %103, %104 : vector<8x64xf32>
    %106 = arith.truncf %105 : vector<8x64xf32> to vector<8x64xbf16>
    %c0_58 = arith.constant 0 : index
    %c0_59 = arith.constant 0 : index
    %107 = vector.load %arg11[%c0_58, %c0_59] : memref<64x32xbf16, #tpu.memory_space<vmem>>, vector<64x32xbf16>
    %cst_60 = arith.constant dense<0.000000e+00> : vector<8x32xf32>
    %108 = tpu.matmul %106, %107, %cst_60 {dimension_numbers = #tpu.dot_dimension_numbers<[1], [0], [0], [1], [0, 0, 1, 1], [], []>} : vector<8x64xbf16>, vector<64x32xbf16>, vector<8x32xf32> -> vector<8x32xf32>
    %c0_61 = arith.constant 0 : index
    %c0_62 = arith.constant 0 : index
    %109 = vector.load %arg12[%c0_61, %c0_62] : memref<1x32xf32, #tpu.memory_space<vmem>>, vector<1x32xf32>
    %110 = vector.broadcast %109 : vector<1x32xf32> to vector<8x32xf32>
    %111 = arith.addf %108, %110 : vector<8x32xf32>
    %112 = arith.addf %97, %111 : vector<8x32xf32>
    %cst_63 = arith.constant dense<0.000000e+00> : vector<8xf32>
    %113 = vector.multi_reduction <add>, %112, %cst_63 [1] : vector<8x32xf32> to vector<8xf32>
    %114 = vector.shape_cast %113 : vector<8xf32> to vector<8x1xf32>
    %cst_64 = arith.constant 3.200000e+01 : f32
    %115 = vector.broadcast %cst_64 : f32 to vector<8x1xf32>
    %116 = arith.divf %114, %115 : vector<8x1xf32>
    %117 = vector.broadcast %116 : vector<8x1xf32> to vector<8x32xf32>
    %118 = arith.subf %112, %117 : vector<8x32xf32>
    %119 = arith.mulf %118, %118 : vector<8x32xf32>
    %cst_65 = arith.constant dense<0.000000e+00> : vector<8xf32>
    %120 = vector.multi_reduction <add>, %119, %cst_65 [1] : vector<8x32xf32> to vector<8xf32>
    %121 = vector.shape_cast %120 : vector<8xf32> to vector<8x1xf32>
    %cst_66 = arith.constant 3.200000e+01 : f32
    %122 = vector.broadcast %cst_66 : f32 to vector<8x1xf32>
    %123 = arith.divf %121, %122 : vector<8x1xf32>
    %124 = vector.broadcast %116 : vector<8x1xf32> to vector<8x32xf32>
    %125 = arith.subf %112, %124 : vector<8x32xf32>
    %cst_67 = arith.constant 9.99999974E-6 : f32
    %126 = vector.broadcast %cst_67 : f32 to vector<8x1xf32>
    %127 = arith.addf %123, %126 : vector<8x1xf32>
    %128 = math.rsqrt %127 : vector<8x1xf32>
    %129 = vector.broadcast %128 : vector<8x1xf32> to vector<8x32xf32>
    %130 = arith.mulf %125, %129 : vector<8x32xf32>
    %c0_68 = arith.constant 0 : index
    %c0_69 = arith.constant 0 : index
    %131 = vector.load %arg13[%c0_68, %c0_69] : memref<1x32xf32, #tpu.memory_space<vmem>>, vector<1x32xf32>
    %132 = vector.broadcast %131 : vector<1x32xf32> to vector<8x32xf32>
    %133 = arith.mulf %130, %132 : vector<8x32xf32>
    %c0_70 = arith.constant 0 : index
    %c0_71 = arith.constant 0 : index
    %134 = vector.load %arg14[%c0_70, %c0_71] : memref<1x32xf32, #tpu.memory_space<vmem>>, vector<1x32xf32>
    %135 = vector.broadcast %134 : vector<1x32xf32> to vector<8x32xf32>
    %136 = arith.addf %133, %135 : vector<8x32xf32>
    %c0_72 = arith.constant 0 : index
    %c0_73 = arith.constant 0 : index
    %c0_74 = arith.constant 0 : index
    %137 = vector.load %arg15[%c0_72, %c0_73, %c0_74] : memref<1x8x32xf32, #tpu.memory_space<vmem>>, vector<1x8x32xf32>
    %138 = vector.shape_cast %137 : vector<1x8x32xf32> to vector<8x32xf32>
    %139 = vector.shape_cast %136 : vector<8x32xf32> to vector<1x8x32xf32>
    tpu.vector_store %arg15[%c0_72, %c0_73, %c0_74], %139 {strides = array<i32>} : memref<1x8x32xf32, #tpu.memory_space<vmem>>, vector<1x8x32xf32>,
    return
  }
  func.func @transform_0(%arg0: i32, %arg1: memref<2xi32, #tpu.memory_space<smem>>) -> (i32, i32, i32) {
    %c0_i32 = arith.constant 0 : i32
    %c0_i32_0 = arith.constant 0 : i32
    %c0_i32_1 = arith.constant 0 : i32
    return %arg0, %c0_i32, %c0_i32_0 : i32, i32, i32
  }
  func.func @transform_1(%arg0: i32, %arg1: memref<2xi32, #tpu.memory_space<smem>>) -> (i32, i32, i32) {
    %c0_i32 = arith.constant 0 : i32
    %c0_i32_0 = arith.constant 0 : i32
    %c0_i32_1 = arith.constant 0 : i32
    %c0_i32_2 = arith.constant 0 : i32
    return %c0_i32, %c0_i32_0, %c0_i32_1 : i32, i32, i32
  }
  func.func @transform_2(%arg0: i32, %arg1: memref<2xi32, #tpu.memory_space<smem>>) -> (i32, i32, i32) {
    %c0_i32 = arith.constant 0 : i32
    %c0_i32_0 = arith.constant 0 : i32
    %c0_i32_1 = arith.constant 0 : i32
    %c0_i32_2 = arith.constant 0 : i32
    return %c0_i32, %c0_i32_0, %c0_i32_1 : i32, i32, i32
  }
  func.func @transform_3(%arg0: i32, %arg1: memref<2xi32, #tpu.memory_space<smem>>) -> (i32, i32, i32) {
    %c0_i32 = arith.constant 0 : i32
    %c0_i32_0 = arith.constant 0 : i32
    %c0_i32_1 = arith.constant 0 : i32
    %c0_i32_2 = arith.constant 0 : i32
    return %c0_i32, %c0_i32_0, %c0_i32_1 : i32, i32, i32
  }
  func.func @transform_4(%arg0: i32, %arg1: memref<2xi32, #tpu.memory_space<smem>>) -> (i32, i32, i32) {
    %c0_i32 = arith.constant 0 : i32
    %c0_i32_0 = arith.constant 0 : i32
    %c0_i32_1 = arith.constant 0 : i32
    %c0_i32_2 = arith.constant 0 : i32
    return %c0_i32, %c0_i32_0, %c0_i32_1 : i32, i32, i32
  }
  func.func @transform_5(%arg0: i32, %arg1: memref<2xi32, #tpu.memory_space<smem>>) -> (i32, i32) {
    %c0_i32 = arith.constant 0 : i32
    %c0_i32_0 = arith.constant 0 : i32
    %c0_i32_1 = arith.constant 0 : i32
    return %c0_i32, %c0_i32_0 : i32, i32
  }
  func.func @transform_6(%arg0: i32, %arg1: memref<2xi32, #tpu.memory_space<smem>>) -> (i32, i32) {
    %c0_i32 = arith.constant 0 : i32
    %c0_i32_0 = arith.constant 0 : i32
    %c0_i32_1 = arith.constant 0 : i32
    return %c0_i32, %c0_i32_0 : i32, i32
  }
  func.func @transform_7(%arg0: i32, %arg1: memref<2xi32, #tpu.memory_space<smem>>) -> (i32, i32) {
    %c0_i32 = arith.constant 0 : i32
    %c0_i32_0 = arith.constant 0 : i32
    %c0_i32_1 = arith.constant 0 : i32
    return %c0_i32, %c0_i32_0 : i32, i32
  }
  func.func @transform_8(%arg0: i32, %arg1: memref<2xi32, #tpu.memory_space<smem>>) -> (i32, i32) {
    %c0_i32 = arith.constant 0 : i32
    %c0_i32_0 = arith.constant 0 : i32
    %c0_i32_1 = arith.constant 0 : i32
    return %c0_i32, %c0_i32_0 : i32, i32
  }
  func.func @transform_9(%arg0: i32, %arg1: memref<2xi32, #tpu.memory_space<smem>>) -> (i32, i32) {
    %c0_i32 = arith.constant 0 : i32
    %c0_i32_0 = arith.constant 0 : i32
    %c0_i32_1 = arith.constant 0 : i32
    return %c0_i32, %c0_i32_0 : i32, i32
  }
  func.func @transform_10(%arg0: i32, %arg1: memref<2xi32, #tpu.memory_space<smem>>) -> (i32, i32) {
    %c0_i32 = arith.constant 0 : i32
    %c0_i32_0 = arith.constant 0 : i32
    %c0_i32_1 = arith.constant 0 : i32
    return %c0_i32, %c0_i32_0 : i32, i32
  }
  func.func @transform_11(%arg0: i32, %arg1: memref<2xi32, #tpu.memory_space<smem>>) -> (i32, i32) {
    %c0_i32 = arith.constant 0 : i32
    %c0_i32_0 = arith.constant 0 : i32
    %c0_i32_1 = arith.constant 0 : i32
    return %c0_i32, %c0_i32_0 : i32, i32
  }
  func.func @transform_12(%arg0: i32, %arg1: memref<2xi32, #tpu.memory_space<smem>>) -> (i32, i32) {
    %c0_i32 = arith.constant 0 : i32
    %c0_i32_0 = arith.constant 0 : i32
    %c0_i32_1 = arith.constant 0 : i32
    return %c0_i32, %c0_i32_0 : i32, i32
  }
  func.func @transform_13(%arg0: i32, %arg1: memref<2xi32, #tpu.memory_space<smem>>) -> (i32, i32, i32) {
    %c0_i32 = arith.constant 0 : i32
    %c0_i32_0 = arith.constant 0 : i32
    %c0_i32_1 = arith.constant 0 : i32
    return %arg0, %c0_i32, %c0_i32_0 : i32, i32, i32
  }
}

</mosaic_0001>

<bundles_post_ra>
// kernel: tpu_custom_call.1
= control target key start
LH: loop header
LB: loop body
LE: loop exit
PB: predicated region body
PF: predicated region fallthrough
CT: control target
= control target key end

     0   :  { %s1314_s16 = smov [#allocation3]   ;;  %s1605_s0 = inlined_call_operand.vmem [shape: s32[2], index: 0, kind: input, shape index: {}]   ;;  %s1606_s1 = inlined_call_operand.vmem [shape: f32[2,8,32], index: 1, kind: input, shape index: {}]   ;;  %s1607_s2 = inlined_call_operand.vmem [shape: bf16[2,32,16], index: 2, kind: input, shape index: {}]   ;;  %s1608_s3 = inlined_call_operand.vmem [shape: bf16[2,32,16], index: 3, kind: input, shape index: {}]   ;;  %s1609_s4 = inlined_call_operand.vmem [shape: bf16[2,32,16], index: 4, kind: input, shape index: {}]   ;;  %s1610_s5 = inlined_call_operand.vmem [shape: bf16[2,16,32], index: 5, kind: input, shape index: {}]   ;;  %s1611_s6 = inlined_call_operand.vmem [shape: f32[1,32], index: 6, kind: input, shape index: {}]   ;;  %s1612_s7 = inlined_call_operand.vmem [shape: f32[1,32], index: 7, kind: input, shape index: {}]   ;;  %s1613_s8 = inlined_call_operand.vmem [shape: bf16[32,64], index: 8, kind: input, shape index: {}]   ;;  %s1614_s9 = inlined_call_operand.vmem [shape: f32[1,64], index: 9, kind: input, shape index: {}]   ;;  %s1615_s10 = inlined_call_operand.vmem [shape: bf16[64,32], index: 10, kind: input, shape index: {}]   ;;  %s1616_s11 = inlined_call_operand.vmem [shape: f32[1,32], index: 11, kind: input, shape index: {}]   ;;  %s1617_s12 = inlined_call_operand.vmem [shape: f32[1,32], index: 12, kind: input, shape index: {}]   ;;  %s1618_s13 = inlined_call_operand.vmem [shape: f32[1,32], index: 13, kind: input, shape index: {}]   ;;  %s1619_s14 = inlined_call_operand.hbm [shape: f32[2,8,32], index: 14, kind: output, shape index: {}]  }
   0x1   :  { %1623 = sst [smem:[#allocation11_spill]] %s1606_s1  ;;  %s20_s15 = sshll.u32 %s1605_s0, 4  ;;  %s21_s15 = int_to_ptr.vmem [resolvable:$true] %s20_s15 }
   0x2   :  { %23 = dma.vmem_to_smem %s21_s15, 16, %s1314_s16, [#allocation2] }
   0x3   :  { %1292 = dma.done.wait [#allocation2], 16 }
   0x4   :  { %1293 = vsyncadd [#allocation2], 4294967280 }
   0x5   :  { %26 = sfence }
   0x6   :  { %27 = vsyncpa [#allocation5], 0 }
   0x7   :  { %29 = vsyncpa [#allocation5 + $0x1], 0  ;;  %s1394_s17 = smov 0   ;;  %s1396_s18 = smov 0  }
   0x8   :  { %s1398_s19 = smov 0   ;;  %s1400_s20 = smov 0  }
   0x9 LB: > { %1624 = sst [smem:[#allocation8_spill]] %s1308_s19  ;;  %s1415_s0 = sadd.s32 4294967295, %s1312_s20   ;;  %s1312_s20 = sphi %s1400_s20, %s1632_s20   ;;  %s1308_s19 = sphi %s1398_s19, %s1634_s19   ;;  %s1304_s18 = sphi %s1396_s18, %s1636_s18   ;;  %s1300_s17 = sphi %s1394_s17, %s1635_s17  }
   0xa   : > { %s1037_s21 = sadd.s32 4294967294, %s1312_s20   ;;  %s1419_s22 = sadd.s32 1, %s1312_s20  }
   0xb   : > { %1625 = sst [smem:[#allocation9_spill]] %s1419_s22  ;;  %s320_s23 = sadd.s32 1, %s1308_s19 }
   0xc   : > { %s317_s24 = ssub.s32 %s1312_s20, %s1419_s22  ;;  %p330_p0 = scmp.ne.s32.totalorder %s1308_s19, %s1304_s18 }
   0xd   : > { %p318_p1 = scmp.eq.s32.totalorder %s317_s24, 0  ;;  %p331_p2 = scmp.eq.s32.totalorder %s1415_s0, 1 }
   0xe   : > { %p336_p3 = scmp.ne.s32.totalorder %s1304_s18, %s1300_s17  ;;  %p337_p4 = scmp.eq.s32.totalorder %s1037_s21, 1 }
   0xf   : > { %s1430_s25 = scalar_select %p318_p1, %s1308_s19, %s320_s23  }
  0x10   : > { %p1432_p5 = por %p331_p2, %p330_p0  ;;  %p1436_p6 = por %p337_p4, %p336_p3 }
  0x11   : > { %1626 = sst [smem:[#allocation10_spill]] %s1430_s25  ;;  %p1040_p7 = scmp.ge.s32.totalorder %s1312_s20, 1 }
  0x12   : > { %p398_p8 = scmp.lt.s32.totalorder %s1312_s20, 3 }
  0x14   : > { %p399_p9 = pnand %p1040_p7, %p398_p8 }
  0x15   : > { %p441_p10 = scmp.lt.s32.totalorder (!%p399_p9), %s1415_s0, 1  ;;  %s1629_s1 = sld [smem:[#allocation11_spill]] (!%p399_p9) }
  0x16   : > { %402 = sbr.rel (%p399_p9) target bundleno = 2027 (0x7eb), region = 72  ;;  %s448_s24 = sld [smem:[#allocation3 + %s1415_s0]] (!%p399_p9) }
  0x17   : > { %s1152_s29 = sshll.u32 (!%p399_p9), %s1415_s0, 3 }
  0x18   : > { %s973_s15 = scalar_lea.hbm (!%p399_p9), %s1619_s14, %s1152_s29 }
  0x1b   : > { %v1156_v0 = vld [vmem:[%s1607_s2 + $0x8] sm:$0xff]  ;;  %v1155_v2 = vld [vmem:[%s1607_s2] sm:$0xff]  ;;  %s442_s25 = scalar_select %p441_p10, %s1415_s0, 1  ;;  %vm469_vm0 = vcmask 261120   ;;  %vm546_vm1 = vcmask 130048   ;;  %v1165_v15 = vld [vmem:[%s1608_s3 + $0x18] sm:$0xff]  ;;  %v449_v17 = vlaneseq }
  0x1c   : > { %v1158_v1 = vld [vmem:[%s1608_s3 + $0x8] sm:$0xff]  ;;  %479 = vmatpush.bf16.msra.mxu0 %v1156_v0  ;;  %v1157_v3 = vld [vmem:[%s1608_s3] sm:$0xff]  ;;  %v1164_v16 = vld [vmem:[%s1608_s3 + $0x10] sm:$0xff]  ;;  %v451_v19 = vstv %s448_s24  ;;  %vm567_vm3 = vcmask 64512   ;;  %vm584_vm4 = vcmask 1043456   ;;  %vm911_vm9 = vcmask 523264  }
  0x1d   : > { %508 = vmatpush.bf16.msra.mxu1 %v1158_v1  ;;  %s1042_s28 = sshll.u32 %s442_s25, 3  ;;  %v1160_v13 = vld [vmem:[%s1609_s4 + $0x8] sm:$0xff]  ;;  %v1159_v14 = vld [vmem:[%s1609_s4] sm:$0xff]  ;;  %v450_v18 = vand.u32 127, %v449_v17  ;;  %v1163_v25 = vld [vmem:[%s1607_s2 + $0x18] sm:$0xff]  ;;  %s438_s24 = sand.u32 1, %s1304_s18  }
  0x1e   : > { %s444_s22 = scalar_lea.vmem %s1629_s1, %s1042_s28  ;;  %537 = vmatpush.bf16.msra.mxu2 %v1160_v13  ;;  %v1162_v26 = vld [vmem:[%s1607_s2 + $0x10] sm:$0xff]  ;;  %v1167_v42 = vld [vmem:[%s1609_s4 + $0x18] sm:$0xff]  ;;  %v1161_v49 = vld [vmem:[%s1610_s5] sm:$0xff]  ;;  %s1041_s28 = sshll.u32 %s438_s24, 3 }
  0x1f   : > { %v1459_v4 = vld [vmem:[%s444_s22] sm:$0xff]  ;;  %vm1486_vm2 = vcmp.lt.s32.totalorder %v450_v18, %v451_v19  ;;  %v1166_v43 = vld [vmem:[%s1609_s4 + $0x10] sm:$0xff]  ;;  %v1315_v18 = vmov 32.0   ;;  %s440_s23 = scalar_lea.vmem [#allocation4], %s1041_s28  ;;  %s977_s1 = sshll.u32 %s973_s15, 4  ;;  %s978_s1 = int_to_ptr.hbm [resolvable:$true] %s977_s1 }
  0x20   : > { %480 = vmatpush.bf16.msra.mxu0 %v1155_v2  ;;  %v1463_v5 = vpack.c.bf16 %v1459_v4, %v1459_v4  ;;  %s975_s0 = sshll.u32 %s440_s23, 4  ;;  %s963_s19 = scalar_lea.sflag [#allocation5], %s438_s24  ;;  %s976_s0 = int_to_ptr.vmem [resolvable:$true] %s975_s0 }
  0x21   : > { %509 = vmatpush.bf16.msra.mxu1 %v1157_v3  ;;  %s1262_s22 = sshra.s32 %s978_s1, 4  ;;  %s1268_s28 = scalar_lea.hbm %s1619_s14, 16  ;;  %s1263_s22 = int_to_ptr.hbm [resolvable:$true] %s1262_s22 }
  0x22   : > { %538 = vmatpush.bf16.msra.mxu2 %v1159_v14  ;;  %s1264_s29 = scalar_lea.hbm %s1263_s22, 8  ;;  %p1269_p0 = scmp.lt.s32.totalorder %s1263_s22, %s1619_s14 }
  0x23   : > { %1051 = vmatmul.msk.bf16.vlgmr.msra.gmra.mxu0 %vm469_vm0, %v1463_v5  ;;  %p1265_p11 = scmp.ne.s32.totalorder %s1263_s22, %s1264_s29  ;;  %p1270_p1 = scmp.lt.s32.totalorder %s1268_s28, %s1264_s29 }
  0x24   : > { %1060 = vmatmul.msk.bf16.vlgmr.msra.gmra.mxu1 %vm469_vm0, %v1463_v5 }
  0x25   : > { %1069 = vmatmul.msk.bf16.vlgmr.msra.gmra.mxu2 %vm469_vm0, %v1463_v5  ;;  %627 = vmatpush.bf16.msrb.mxu1 %v1163_v25  ;;  %p1266_p12 = pnand %p1265_p11, %p1432_p5  ;;  %p1271_p2 = por %p1270_p1, %p1269_p0 }
  0x26   : > { %657 = vmatpush.bf16.msrb.mxu2 %v1165_v15 }
  0x27   : > { %p1267_p13 = pneg %p1266_p12 }
  0x29   : > { %628 = vmatpush.bf16.msrb.mxu1 %v1162_v26  ;;  %p1272_p3 = pnand %p1271_p2, %p1267_p13 }
  0x2a   : > { %658 = vmatpush.bf16.msrb.mxu2 %v1164_v16 }
  0x34   : > { %1084 = vmatmul.msk.bf16.vlgmr.msrb.gmra.mxu1 %vm469_vm0, %v1463_v5 }
  0x35   : > { %1097 = vmatmul.msk.bf16.vlgmr.msrb.gmra.mxu2 %vm469_vm0, %v1463_v5 }
  0xa0   : > { %v482_v6 = vpop.f32.mrf.mxu0 }
  0xa1   : > { %v511_v7 = vpop.f32.mrf.mxu1  ;;  %v544_v10 = vpack.c.bf16 %v482_v6, %v482_v6 }
  0xa2   : > { %v545_v8 = vpack.c.bf16 %v511_v7, %v511_v7 }
  0xa4   : > { %v551_v9 = vsel %vm546_vm1, %v545_v8, 0 }
  0xa5   : > { %560 = vmatpush.bf16.xpose.msra.mxu3 %v551_v9 }
  0xa8   : > { %v484_v11 = vpop.f32.mrf.mxu0  ;;  %v540_v27 = vpop.f32.mrf.mxu2 }
  0xa9   : > { %v513_v12 = vpop.f32.mrf.mxu1  ;;  %v580_v28 = vpack.c.bf16 %v540_v27, %v540_v27 }
  0xab   : > { %v586_v31 = vsel %vm584_vm4, %v580_v28, 0 }
  0xac   : > { %1070 = vmatmul.msk.bf16.vlgmr.msra.gmra.mxu3 %vm546_vm1, %v544_v10  ;;  %595 = vmatpush.bf16.msrb.mxu0 %v586_v31  ;;  %v1174_v31 = vld [vmem:[%s1615_s10 + $0x18] sm:$0xff] }
  0xad   : > { %687 = vmatpush.bf16.msrb.mxu3 %v1167_v42 }
  0xb0   : > { %v542_v33 = vpop.f32.mrf.mxu2 }
  0xb1   : > { %v630_v40 = vpop.f32.mrf.mxu1  ;;  %688 = vmatpush.bf16.msrb.mxu3 %v1166_v43  ;;  %v1216_v43 = vld [vmem:[%s1611_s6] ss:$0 sm:$0xff] }
  0xb2   : > { %v694_v48 = vpack.c.bf16 %v630_v40, %v630_v40 }
  0xb5   : > { %790 = vmatpush.bf16.msra.mxu3 %v1161_v49 }
  0xb8   : > { %v660_v36 = vpop.f32.mrf.mxu2 }
  0xb9   : > { %v695_v37 = vpack.c.bf16 %v660_v36, %v660_v36  ;;  %v632_v41 = vpop.f32.mrf.mxu1  ;;  %v1172_v36 = vld [vmem:[%s1615_s10 + $0x8] sm:$0xff] }
  0xbb   : > { %v700_v38 = vsel %vm546_vm1, %v695_v37, 0 }
  0xbc   : > { %709 = vmatpush.bf16.xpose.msra.mxu0 %v700_v38  ;;  %1110 = vmatmul.msk.bf16.vlgmr.msrb.gmra.mxu3 %vm469_vm0, %v1463_v5  ;;  %v1168_v5 = vld [vmem:[%s1610_s5 + $0x8] sm:$0xff] }
  0xbd   : > { %768 = vmatpush.bf16.msra.mxu2 %v1168_v5 }
  0xc0   : > { %v662_v39 = vpop.f32.mrf.mxu2 }
 0x12f   : > { %v562_v21 = vpop.f32.mrf.mxu3 }
 0x130   : > { %v566_v22 = vsel %vm1486_vm2, %v562_v21, -1000000.0 }
 0x131   : > { %v568_v23 = vsel %vm567_vm3, %v566_v22, -inf }
 0x132   : > { %569 = vmax.xlane.f32.xlu0 %v568_v23 }
 0x137   : > { %v564_v24 = vpop.f32.mrf.mxu3 }
 0x13f   : > { %v690_v50 = vpop.f32.mrf.mxu3 }
 0x140   : > { %v728_v52 = vpack.c.bf16 %v690_v50, %v690_v50  ;;  %v1171_v50 = vld [vmem:[%s1615_s10] sm:$0xff] }
 0x142   : > { %v733_v54 = vsel %vm584_vm4, %v728_v52, 0 }
 0x143   : > { %742 = vmatpush.bf16.msra.mxu1 %v733_v54 }
 0x147   : > { %v692_v55 = vpop.f32.mrf.mxu3  ;;  %919 = vmatpush.bf16.msrb.mxu1 %v1174_v31 }
 0x1a5   : > { %v570_v29 = vpop.xlane.xlu0 %569 }
 0x1a6   : > { %v571_v30 = vsub.f32 %v566_v22, %v570_v29 }
 0x1a8   : > { %v572_v32 = vmul.f32 1.442695, %v571_v30  ;;  %v1169_v30 = vld [vmem:[%s1613_s8] sm:$0xff] }
 0x1aa   : > { %1222 = vpow2.f32 %v572_v32 }
 0x1b0   : > { %v1223_v34 = vpop.eup %1222 }
 0x1b1   : > { %v574_v35 = vsel %vm567_vm3, %v1223_v34, 0.0 }
 0x1b2   : > { %575 = vadd.xlane.f32.xlu0 %v574_v35 }
 0x225   : > { %v576_v44 = vpop.xlane.xlu0 %575 }
 0x226   : > { %1224 = vrcp.f32 %v576_v44 }
 0x22c   : > { %v1225_v45 = vpop.eup %1224 }
 0x22d   : > { %v578_v46 = vmul.f32 %v1225_v45, %v1223_v34  ;;  %v1173_v34 = vld [vmem:[%s1615_s10 + $0x10] sm:$0xff]  ;;  %v1217_v45 = vld [vmem:[%s1612_s7] ss:$0 sm:$0xff] }
 0x22e   : > { %920 = vmatpush.bf16.msrb.mxu1 %v1173_v34 }
 0x22f   : > { %v579_v47 = vpack.c.bf16 %v578_v46, %v578_v46 }
 0x231   : > { %1071 = vmatmul.msk.bf16.vlgmr.msrb.gmra.mxu0 %vm567_vm3, %v579_v47 }
 0x232   : > { %921 = vmatpush.bf16.msrb.mxu1 %v1172_v36 }
 0x236   : > { %922 = vmatpush.bf16.msrb.mxu1 %v1171_v50 }
 0x241   : > { %1111 = vmatmul.msk.bf16.vlgmr.msra.gmra.mxu0 %vm546_vm1, %v694_v48 }
 0x2ae   : > { %v597_v51 = vpop.f32.mrf.mxu0 }
 0x2af   : > { %v601_v53 = vpack.c.bf16 %v597_v51, %v597_v51  ;;  %v1218_v51 = vld [vmem:[%s1614_s9] ss:$0 sm:$0xff] }
 0x2b1   : > { %1124 = vmatmul.msk.bf16.vlgmr.msra.gmra.mxu3 %vm546_vm1, %v601_v53 }
 0x2b6   : > { %v599_v56 = vpop.f32.mrf.mxu0 }
 0x2be   : > { %v711_v57 = vpop.f32.mrf.mxu0 }
 0x2bf   : > { %v715_v58 = vsel %vm1486_vm2, %v711_v57, -1000000.0  ;;  %v1219_v57 = vld [vmem:[%s1616_s11] ss:$0 sm:$0xff] }
 0x2c0   : > { %v716_v59 = vsel %vm567_vm3, %v715_v58, -inf }
 0x2c1   : > { %717 = vmax.xlane.f32.xlu1 %v716_v59 }
 0x2c6   : > { %v713_v60 = vpop.f32.mrf.mxu0 }
 0x334   : > { %v792_v61 = vpop.f32.mrf.mxu3  ;;  %v718_v62 = vpop.xlane.xlu1 %717 }
 0x335   : > { %v719_v63 = vsub.f32 %v715_v58, %v718_v62 }
 0x337   : > { %v720_v0 = vmul.f32 1.442695, %v719_v63 }
 0x339   : > { %1226 = vpow2.f32 %v720_v0 }
 0x33c   : > { %v794_v1 = vpop.f32.mrf.mxu3 }
 0x33f   : > { %v1227_v2 = vpop.eup %1226 }
 0x340   : > { %v722_v3 = vsel %vm567_vm3, %v1227_v2, 0.0 }
 0x341   : > { %723 = vadd.xlane.f32.xlu1 %v722_v3 }
 0x3b4   : > { %v724_v6 = vpop.xlane.xlu1 %723 }
 0x3b5   : > { %1228 = vrcp.f32 %v724_v6 }
 0x3b6   : > { %1230 = vrcp.f32 %v1315_v18 }
 0x3bb   : > { %v1229_v7 = vpop.eup %1228 }
 0x3bc   : > { %v726_v8 = vmul.f32 %v1229_v7, %v1227_v2  ;;  %v1231_v19 = vpop.eup %1230 }
 0x3bd   : > { %v801_v20 = vmul.f32 32.0, %v1231_v19  ;;  %vm805_vm5 = vweird.f32 %v1231_v19 }
 0x3be   : > { %v727_v9 = vpack.c.bf16 %v726_v8, %v726_v8 }
 0x3bf   : > { %v802_v21 = vsub.f32 1.0, %v801_v20 }
 0x3c0   : > { %1112 = vmatmul.msk.bf16.vlgmr.msra.gmra.mxu1 %vm567_vm3, %v727_v9 }
 0x3c1   : > { %v803_v22 = vmul.f32 %v1231_v19, %v802_v21 }
 0x3c3   : > { %v804_v23 = vadd.f32 %v1231_v19, %v803_v22 }
 0x3c5   : > { %v806_v24 = vsel %vm805_vm5, %v1231_v19, %v804_v23 }
 0x43d   : > { %v744_v10 = vpop.f32.mrf.mxu1 }
 0x43e   : > { %v748_v11 = vpack.c.bf16 %v744_v10, %v744_v10 }
 0x440   : > { %1119 = vmatmul.msk.bf16.vlgmr.msra.gmra.mxu2 %vm546_vm1, %v748_v11 }
 0x445   : > { %v746_v12 = vpop.f32.mrf.mxu1 }
 0x4c3   : > { %v770_v13 = vpop.f32.mrf.mxu2 }
 0x4c4   : > { %v793_v14 = vadd.f32 %v792_v61, %v770_v13 }
 0x4c6   : > { %v796_v15 = vadd.f32 %v793_v14, %v1459_v4  ;;  %v1170_v4 = vld [vmem:[%s1613_s8 + $0x8] sm:$0xff]  ;;  %v1220_v14 = vld [vmem:[%s1617_s12] ss:$0 sm:$0xff] }
 0x4c7   : > { %866 = vmatpush.bf16.msrb.mxu0 %v1170_v4 }
 0x4c8   : > { %v797_v16 = vsel %vm469_vm0, %v796_v15, 0.0 }
 0x4c9   : > { %798 = vadd.xlane.f32.xlu2 %v797_v16 }
 0x4cb   : > { %v772_v17 = vpop.f32.mrf.mxu2  ;;  %867 = vmatpush.bf16.msrb.mxu0 %v1169_v30 }
 0x4cc   : > { %v1221_v17 = vld [vmem:[%s1618_s13] ss:$0 sm:$0xff] }
 0x53c   : > { %v799_v25 = vpop.xlane.xlu2 %798 }
 0x53d   : > { %v807_v26 = vmul.f32 %v806_v24, %v799_v25 }
 0x53f   : > { %v808_v27 = vsub.f32 %v796_v15, %v807_v26 }
 0x541   : > { %v809_v28 = vmul.f32 %v808_v27, %v808_v27 }
 0x543   : > { %v810_v29 = vsel %vm469_vm0, %v809_v28, 0.0 }
 0x544   : > { %811 = vadd.xlane.f32.xlu2 %v810_v29 }
 0x5b7   : > { %v812_v32 = vpop.xlane.xlu2 %811 }
 0x5b8   : > { %v813_v33 = vmul.f32 %v812_v32, %v806_v24 }
 0x5ba   : > { %v814_v35 = vadd.f32 1e-05, %v813_v33 }
 0x5bc   : > { %1232 = vrsqrt.f32 %v814_v35  ;;  %vm821_vm7 = vweird.f32 %v814_v35 }
 0x5c2   : > { %v1233_v37 = vpop.eup %1232 }
 0x5c3   : > { %v816_v38 = vmul.f32 %v1233_v37, %v814_v35  ;;  %vm822_vm6 = vweird.f32 %v1233_v37 }
 0x5c4   : > { %vm823_vm8 = vmor %vm821_vm7, %vm822_vm6 }
 0x5c5   : > { %v817_v39 = vmul.f32 %v1233_v37, %v816_v38 }
 0x5c7   : > { %v818_v40 = vmul.f32 0.5, %v817_v39 }
 0x5c9   : > { %v819_v41 = vsub.f32 1.5, %v818_v40 }
 0x5cb   : > { %v820_v42 = vmul.f32 %v1233_v37, %v819_v41 }
 0x5cd   : > { %v824_v44 = vsel %vm823_vm8, %v1233_v37, %v820_v42 }
 0x5ce   : > { %v825_v46 = vmul.f32 %v824_v44, %v808_v27 }
 0x5d0   : > { %v830_v47 = vmul.f32 %v1216_v43, %v825_v46 }
 0x5d2   : > { %v835_v48 = vadd.f32 %v1217_v45, %v830_v47 }
 0x5d4   : > { %v836_v49 = vpack.c.bf16 %v835_v48, %v835_v48 }
 0x5d6   : > { %1133 = vmatmul.msk.bf16.vlgmr.msrb.gmra.mxu0 %vm469_vm0, %v836_v49 }
 0x653   : > { %v869_v52 = vpop.f32.mrf.mxu0 }
 0x654   : > { %v870_v53 = vadd.f32 %v1218_v51, %v869_v52 }
 0x656   : > { %v873_v54 = vmax.f32 %v870_v53, 0.0 }
 0x658   : > { %v874_v55 = vpack.c.bf16 %v873_v54, %v873_v54 }
 0x65a   : > { %1150 = vmatmul.msk.bf16.vlgmr.msrb.gmra.mxu1 %vm911_vm9, %v874_v55 }
 0x65b   : > { %v871_v56 = vpop.f32.mrf.mxu0 }
 0x6d7   : > { %v924_v58 = vpop.f32.mrf.mxu1 }
 0x6d8   : > { %v925_v59 = vadd.f32 %v1219_v57, %v924_v58 }
 0x6da   : > { %v928_v60 = vadd.f32 %v925_v59, %v835_v48 }
 0x6dc   : > { %v929_v61 = vsel %vm469_vm0, %v928_v60, 0.0 }
 0x6dd   : > { %930 = vadd.xlane.f32.xlu0 %v929_v61 }
 0x6df   : > { %v926_v62 = vpop.f32.mrf.mxu1 }
 0x750   : > { %v931_v63 = vpop.xlane.xlu0 %930 }
 0x751   : > { %v932_v0 = vmul.f32 %v931_v63, %v806_v24 }
 0x753   : > { %v933_v1 = vsub.f32 %v928_v60, %v932_v0 }
 0x755   : > { %v934_v2 = vmul.f32 %v933_v1, %v933_v1 }
 0x757   : > { %v935_v3 = vsel %vm469_vm0, %v934_v2, 0.0 }
 0x758   : > { %936 = vadd.xlane.f32.xlu1 %v935_v3 }
 0x7cb   : > { %v937_v5 = vpop.xlane.xlu1 %936 }
 0x7cc   : > { %v938_v6 = vmul.f32 %v937_v5, %v806_v24 }
 0x7ce   : > { %v939_v7 = vadd.f32 1e-05, %v938_v6 }
 0x7d0   : > { %1234 = vrsqrt.f32 %v939_v7  ;;  %vm946_vm11 = vweird.f32 %v939_v7 }
 0x7d6   : > { %v1235_v8 = vpop.eup %1234 }
 0x7d7   : > { %v941_v9 = vmul.f32 %v1235_v8, %v939_v7  ;;  %vm947_vm10 = vweird.f32 %v1235_v8 }
 0x7d8   : > { %vm948_vm12 = vmor %vm946_vm11, %vm947_vm10 }
 0x7d9   : > { %v942_v10 = vmul.f32 %v1235_v8, %v941_v9 }
 0x7db   : > { %v943_v11 = vmul.f32 0.5, %v942_v10 }
 0x7dd   : > { %v944_v12 = vsub.f32 1.5, %v943_v11 }
 0x7df   : > { %v945_v13 = vmul.f32 %v1235_v8, %v944_v12 }
 0x7e1   : > { %v949_v15 = vsel %vm948_vm12, %v1235_v8, %v945_v13 }
 0x7e2   : > { %v950_v16 = vmul.f32 %v949_v15, %v933_v1 }
 0x7e4   : > { %v955_v18 = vmul.f32 %v1220_v14, %v950_v16 }
 0x7e6   : > { %v960_v19 = vadd.f32 %v1221_v17, %v955_v18 }
 0x7e8   : > { %961 = vst.msk [vmem:[%s440_s23] sm:$0xff] %vm469_vm0, %v960_v19 }
 0x7e9   : > { %1275 = shalt.err (!%p1272_p3)
}
 0x7ea   : > { %1175 = dma.vmem_to_hbm [thread:$0]  (%p1432_p5), %s976_s0, 128, %s978_s1, %s963_s19  }
 0x7eb PF: > { %p1181_p4 = scmp.ge.s32.totalorder %s1312_s20, 2  ;;  %s989_s24 = sand.u32 1, %s1300_s17  }
 0x7ec   : > { %s990_s21 = scalar_lea.sflag [#allocation5], %s989_s24 }
 0x7ed   : > { %p1178_p7 = pnand %p1181_p4, %p1436_p6 }
 0x7ef   : > { %p1179_p8 = pneg %p1178_p7 }
 0x7f1   : > { %1295 = dma.done.wait (%p1179_p8), %s990_s21, 128  }
 0x7f2   : > { %1297 = vsyncadd (%p1179_p8), %s990_s21, 4294967168  ;;  %s1632_s20 = sld [smem:[#allocation9_spill]]  ;;  %s1635_s17 = smov %s1304_s18 }
 0x7f3   : > { %s1633_s23 = sld [smem:[#allocation8_spill]] }
 0x7f4   : > { %s1634_s19 = sld [smem:[#allocation10_spill]] }
 0x7f8   : > { %p32_p9 = scmp.ge.s32.totalorder %s1632_s20, 4  }
 0x7f9   : > { %s1636_s18 = smov %s1633_s23 }
 0x7fa   :  { %34 = sbr.rel (!%p32_p9) target bundleno = 9 (0x9), region = 111 }
 0x7ff   :  { %996 = vsyncpa [#allocation5], 1 }
 0x800   :  { %998 = vsyncpa [#allocation5 + $0x1], 1 }

</bundles_post_ra>
